<compile_context>
chip_gen: v7x
topology: tpu7x:2x2x1
jax: 0.10.0
libtpu: 0.0.40
codegen_flags: <defaults>
</compile_context>

<pallas_src>
import functools
import math

import jax
import jax.numpy as jnp
from jax import lax
from jax.experimental import pallas as pl
from jax.experimental.pallas import tpu as pltpu

_LANES = 128


def _round_up(a: int, b: int) -> int:
    return ((a + b - 1) // b) * b


def _add_noise_kernel(x_ref, noise_ref, o_ref, *, noise_std):
    # Elementwise: out = clamp(x + std * noise, 0, 1).
    # Load in the stored dtype, compute in f32 vregs, store back in the stored
    # dtype so HBM traffic stays at the narrow width for bf16/f16 inputs.
    x = x_ref[...].astype(jnp.float32)
    n = noise_ref[...].astype(jnp.float32)
    o_ref[...] = jnp.clip(x + noise_std * n, 0.0, 1.0).astype(o_ref.dtype)


def _apply_noise_pallas(x, noise_key, noise_std, tile_rows):
    orig_shape = x.shape
    orig_dtype = x.dtype
    n = int(math.prod(orig_shape))

    # Lane-dense [rows, 128] slab.  Only a <128-element lane remainder is
    # padded; image tensors (B*C*H*W) are normally 128-divisible, so the hot
    # path has no pad / slice HBM passes.
    lane_pad = (-n) % _LANES
    flat = x.reshape(-1)
    if lane_pad:
        flat = jnp.concatenate([flat, jnp.zeros((lane_pad,), dtype=orig_dtype)])
    rows = (n + lane_pad) // _LANES
    xf = flat.reshape(rows, _LANES)

    # Gaussian noise in the input dtype (std=0.01 and the result is clamped, so
    # reduced-precision noise is ample) -> narrow second input stream.
    noise = jax.random.normal(noise_key, xf.shape, dtype=orig_dtype)

    # ~4 MiB f32 blocks, but keep >=4 grid steps so the "parallel" axis shards
    # across both v7x TensorCores; multiple of 16 rows satisfies the bf16
    # (16, 128) tile minimum.
    rows_per_tile = min(int(tile_rows), max(16, _round_up(pl.cdiv(rows, 4), 16)))
    if rows_per_tile >= rows:
        rows_per_tile = rows  # single full-extent block (always a legal shape)
    grid = (pl.cdiv(rows, rows_per_tile),)

    spec = pl.BlockSpec((rows_per_tile, _LANES), lambda i: (i, 0))
    out = pl.pallas_call(
        functools.partial(_add_noise_kernel, noise_std=float(noise_std)),
        out_shape=jax.ShapeDtypeStruct((rows, _LANES), orig_dtype),
        grid=grid,
        in_specs=[spec, spec],
        out_specs=spec,
        compiler_params=pltpu.CompilerParams(
            dimension_semantics=("parallel",),
            vmem_limit_bytes=32 * 1024 * 1024,  # headroom on v7x (64 MiB VMEM)
        ),
    )(xf, noise)

    out = out.reshape(-1)
    if lane_pad:
        out = out[:n]
    return out.reshape(orig_shape)


def brightness_noise_forward(x, *, key, noise_std=0.01, apply_prob=0.3,
                             tile_rows=8192):
    """Pallas implementation of BrightnessNoise.forward.

    With probability `apply_prob` (0.3 in the reference), returns
    clamp(x + noise_std * N(0,1), 0, 1); otherwise returns x unchanged.
    """
    if not jnp.issubdtype(x.dtype, jnp.floating):
        x = x.astype(jnp.float32)

    k_apply, k_noise = jax.random.split(key)
    noisy = functools.partial(_apply_noise_pallas, noise_key=k_noise,
                              noise_std=noise_std, tile_rows=tile_rows)

    # Static shortcuts (e.g. tests / configs forcing one branch).
    if apply_prob >= 1.0:
        return noisy(x)
    if apply_prob <= 0.0:
        return x

    # Apply decision hoisted out of the kernel: the skip path is a true no-op
    # (no HBM read/write of the tensor), instead of an identity copy.
    apply = jax.random.uniform(k_apply, ()) < apply_prob
    return lax.cond(apply, noisy, lambda v: v, x)


if __name__ == "__main__":
    key = jax.random.PRNGKey(0)
    k_img, k_aug1, k_aug2 = jax.random.split(key, 3)

    B, C, H, W = 2, 4, 16, 16
    x = jax.random.uniform(k_img, (B, C, H, W), dtype=jnp.float32)

    # 1) Force the noise branch (exercises the Pallas kernel).
    out_noisy = brightness_noise_forward(x, key=k_aug1, noise_std=0.01,
                                         apply_prob=1.0)
    jax.block_until_ready(out_noisy)
    assert out_noisy.shape == x.shape and out_noisy.dtype == x.dtype
    max_diff = float(jnp.max(jnp.abs(out_noisy - x)))
    assert 0.0 < max_diff < 0.2, max_diff
    assert bool(jnp.all(out_noisy >= 0.0)) and bool(jnp.all(out_noisy <= 1.0))

    # 2) Force the passthrough branch: exact identity, no kernel work.
    out_skip = brightness_noise_forward(x, key=k_aug1, noise_std=0.01,
                                        apply_prob=0.0)
    jax.block_until_ready(out_skip)
    assert bool(jnp.all(out_skip == x))

    # 3) Module-faithful stochastic apply (probability 0.3) through lax.cond.
    out = brightness_noise_forward(x, key=k_aug2, noise_std=0.01, apply_prob=0.3)
    jax.block_until_ready(out)
    assert out.shape == x.shape

    print("KERNEL_OK")
</pallas_src>

<mosaic_0001>
module attributes {stable_mosaic.version = 11 : i64} {
  func.func @_add_noise_kernel(%arg0: i32, %arg1: memref<16x128xf32, #tpu.memory_space<vmem>>, %arg2: memref<16x128xf32, #tpu.memory_space<vmem>>, %arg3: memref<16x128xf32, #tpu.memory_space<vmem>>) attributes {dimension_semantics = [#tpu.dimension_semantics<parallel>], iteration_bounds = array<i64: 1>, scalar_prefetch = 0 : i64, scratch_operands = 0 : i64, tpu.core_type = #tpu.core_type<tc>, window_params = [{transform_indices = @transform_0, window_bounds = array<i64: 16, 128>}, {transform_indices = @transform_1, window_bounds = array<i64: 16, 128>}, {transform_indices = @transform_2, window_bounds = array<i64: 16, 128>}]} {
    %c0 = arith.constant 0 : index
    %c0_0 = arith.constant 0 : index
    %0 = vector.load %arg1[%c0, %c0_0] : memref<16x128xf32, #tpu.memory_space<vmem>>, vector<16x128xf32>
    %c0_1 = arith.constant 0 : index
    %c0_2 = arith.constant 0 : index
    %1 = vector.load %arg2[%c0_1, %c0_2] : memref<16x128xf32, #tpu.memory_space<vmem>>, vector<16x128xf32>
    %cst = arith.constant 0.00999999977 : f32
    %2 = vector.broadcast %cst : f32 to vector<16x128xf32>
    %3 = arith.mulf %2, %1 : vector<16x128xf32>
    %4 = arith.addf %0, %3 : vector<16x128xf32>
    %cst_3 = arith.constant 0.000000e+00 : f32
    %cst_4 = arith.constant 1.000000e+00 : f32
    %5 = vector.broadcast %cst_3 : f32 to vector<16x128xf32>
    %6 = arith.maximumf %5, %4 : vector<16x128xf32>
    %7 = vector.broadcast %cst_4 : f32 to vector<16x128xf32>
    %8 = arith.minimumf %7, %6 : vector<16x128xf32>
    %c0_5 = arith.constant 0 : index
    %c0_6 = arith.constant 0 : index
    %9 = vector.load %arg3[%c0_5, %c0_6] : memref<16x128xf32, #tpu.memory_space<vmem>>, vector<16x128xf32>
    tpu.vector_store %arg3[%c0_5, %c0_6], %8 {strides = array<i32>} : memref<16x128xf32, #tpu.memory_space<vmem>>, vector<16x128xf32>,
    return
  }
  func.func @transform_0(%arg0: i32) -> (i32, i32) {
    %c0_i32 = arith.constant 0 : i32
    %c0_i32_0 = arith.constant 0 : i32
    return %arg0, %c0_i32 : i32, i32
  }
  func.func @transform_1(%arg0: i32) -> (i32, i32) {
    %c0_i32 = arith.constant 0 : i32
    %c0_i32_0 = arith.constant 0 : i32
    return %arg0, %c0_i32 : i32, i32
  }
  func.func @transform_2(%arg0: i32) -> (i32, i32) {
    %c0_i32 = arith.constant 0 : i32
    %c0_i32_0 = arith.constant 0 : i32
    return %arg0, %c0_i32 : i32, i32
  }
}

</mosaic_0001>

<bundles_post_ra>
// kernel: tpu_custom_call.1
= control target key start
LH: loop header
LB: loop body
LE: loop exit
PB: predicated region body
PF: predicated region fallthrough
CT: control target
= control target key end

     0   :  { %7 = vsyncpa [#allocation3], 0  ;;  %s214_s0 = inlined_call_operand.hbm [shape: f32[16,128], index: 0, kind: input, shape index: {}]   ;;  %s215_s1 = inlined_call_operand.hbm [shape: f32[16,128], index: 1, kind: input, shape index: {}]   ;;  %s216_s2 = inlined_call_operand.hbm [shape: f32[16,128], index: 2, kind: output, shape index: {}]  }
   0x1   :  { %8 = vsyncpa [#allocation6], 0 }
   0x2   :  { %9 = vsyncpa [#allocation4], 0  ;;  %s149_s9 = smov [#allocation2]   ;;  %s77_s13 = scalar_lea.hbm %s214_s0, 256 }
   0x3   :  { %s15_s10 = sshll.u32 %s149_s9, 4  ;;  %p78_p0 = scmp.ne.s32.totalorder %s214_s0, %s77_s13  ;;  %s16_s10 = int_to_ptr.vmem [resolvable:$true] %s15_s10 }
   0x4   :  { %p81_p1 = scmp.lt.u32.totalorder %s77_s13, %s214_s0 }
   0x6   :  { %p83_p2 = pnand %p81_p1, %p78_p0 }
   0x8   :  { %86 = shalt.err (!%p83_p2)
}
   0x9   :  { %s87_s18 = scalar_lea.vmem %s16_s10, 256  ;;  %p92_p4 = scmp.lt.s32.totalorder %s16_s10, %s16_s10 }
   0xa   :  { %p88_p3 = scmp.ne.s32.totalorder %s16_s10, %s87_s18  ;;  %p93_p5 = scmp.lt.s32.totalorder %s87_s18, %s87_s18 }
   0xc   :  { %p94_p6 = por %p93_p5, %p92_p4 }
   0xe   :  { %p95_p7 = pnand %p94_p6, %p88_p3 }
  0x10   :  { %98 = shalt.err (!%p95_p7)
}
  0x11   :  { %s150_s19 = smov 128   ;;  %s151_s20 = smov 8  }
  0x12   :  { %21 = dma.hbm_to_vmem [thread:$0]  %s214_s0, 256, %s16_s10, [#allocation3], %s150_s19, %s150_s19, %s151_s20  }
  0x13   :  { %s152_s23 = smov [#allocation5]   ;;  %s99_s27 = scalar_lea.hbm %s215_s1, 256 }
  0x14   :  { %s27_s24 = sshll.u32 %s152_s23, 4  ;;  %p100_p8 = scmp.ne.s32.totalorder %s215_s1, %s99_s27  ;;  %s28_s24 = int_to_ptr.vmem [resolvable:$true] %s27_s24 }
  0x15   :  { %p103_p9 = scmp.lt.u32.totalorder %s99_s27, %s215_s1 }
  0x17   :  { %p105_p10 = pnand %p103_p9, %p100_p8 }
  0x19   :  { %108 = shalt.err (!%p105_p10)
}
  0x1a   :  { %s109_s4 = scalar_lea.vmem %s28_s24, 256  ;;  %p114_p12 = scmp.lt.s32.totalorder %s28_s24, %s28_s24 }
  0x1b   :  { %p110_p11 = scmp.ne.s32.totalorder %s28_s24, %s109_s4  ;;  %p115_p13 = scmp.lt.s32.totalorder %s109_s4, %s109_s4 }
  0x1d   :  { %p116_p0 = por %p115_p13, %p114_p12 }
  0x1f   :  { %p117_p1 = pnand %p116_p0, %p110_p11 }
  0x21   :  { %120 = shalt.err (!%p117_p1)
}
  0x22   :  { %33 = dma.hbm_to_vmem [thread:$0]  %s215_s1, 256, %s28_s24, [#allocation6], %s150_s19, %s150_s19, %s151_s20  }
  0x23   :  { %143 = dma.done.wait [#allocation3], 256  }
  0x24   :  { %144 = vsyncadd [#allocation3], 4294967040 }
  0x25   :  { %145 = dma.done.wait [#allocation6], 256  }
  0x26   :  { %146 = vsyncadd [#allocation6], 4294967040  ;;  %v40_v0 = vld [vmem:[#allocation2] sm:$0xff]  ;;  %v42_v1 = vld [vmem:[#allocation5] sm:$0xff]  ;;  %s153_s6 = smov [#allocation7]  }
  0x27   :  { %v44_v2 = vmul.f32 0.01, %v42_v1  ;;  %v41_v3 = vld [vmem:[#allocation2 + $0x8] sm:$0xff]  ;;  %v43_v4 = vld [vmem:[#allocation5 + $0x8] sm:$0xff]  ;;  %s59_s7 = sshll.u32 %s153_s6, 4  ;;  %s60_s7 = int_to_ptr.vmem [resolvable:$true] %s59_s7 }
  0x28   :  { %v45_v5 = vmul.f32 0.01, %v43_v4  ;;  %s121_s1 = scalar_lea.vmem %s60_s7, 256  ;;  %p126_p3 = scmp.lt.s32.totalorder %s60_s7, %s60_s7 }
  0x29   :  { %v46_v6 = vadd.f32 %v44_v2, %v40_v0  ;;  %p122_p2 = scmp.ne.s32.totalorder %s60_s7, %s121_s1  ;;  %p127_p4 = scmp.lt.s32.totalorder %s121_s1, %s121_s1 }
  0x2a   :  { %v47_v7 = vadd.f32 %v45_v5, %v41_v3 }
  0x2b   :  { %v48_v8 = vmax.f32 %v46_v6, 0.0  ;;  %p128_p5 = por %p127_p4, %p126_p3 }
  0x2c   :  { %v49_v9 = vmax.f32 %v47_v7, 0.0 }
  0x2d   :  { %v50_v10 = vmin.f32 %v48_v8, 1.0  ;;  %p129_p6 = pnand %p128_p5, %p122_p2 }
  0x2e   :  { %v51_v11 = vmin.f32 %v49_v9, 1.0 }
  0x2f   :  { %52 = vst [vmem:[#allocation7] sm:$0xff] %v50_v10 }
  0x30   :  { %53 = vst [vmem:[#allocation7 + $0x8] sm:$0xff] %v51_v11 }
  0x31   :  { %132 = shalt.err (!%p129_p6)
}
  0x32   :  { %s133_s10 = scalar_lea.hbm %s216_s2, 256 }
  0x33   :  { %p134_p7 = scmp.ne.s32.totalorder %s216_s2, %s133_s10  ;;  %p137_p8 = scmp.lt.u32.totalorder %s133_s10, %s216_s2 }
  0x35   :  { %p139_p9 = pnand %p137_p8, %p134_p7 }
  0x37   :  { %142 = shalt.err (!%p139_p9)
}
  0x38   :  { %65 = dma.vmem_to_hbm [thread:$0]  %s60_s7, 256, %s216_s2, [#allocation4], %s150_s19, %s150_s19, %s151_s20  }
  0x39   :  { %147 = dma.done.wait [#allocation4], 256  }
  0x3a   :  { %148 = vsyncadd [#allocation4], 4294967040 }
  0x3b   :  { %69 = vsyncpa [#allocation3], 1 }
  0x3c   :  { %70 = vsyncpa [#allocation6], 1 }
  0x3d   :  { %71 = vsyncpa [#allocation4], 1 }

</bundles_post_ra>
